<compile_context>
chip_gen: v7x
topology: tpu7x:2x2x1
jax: 0.10.0
libtpu: 0.0.40
codegen_flags: <defaults>
</compile_context>

<pallas_src>
import functools

import jax
import jax.numpy as jnp
from jax.experimental import pallas as pl
from jax.experimental.pallas import tpu as pltpu

_LANE = 128


def _round_up(x, m):
    return (x + m - 1) // m * m


def _pad2d(x, rows, cols):
    out = jnp.zeros((rows, cols), x.dtype)
    return out.at[: x.shape[0], : x.shape[1]].set(x)


# --------------------------------------------------------------------------
# Tiled matmul (+ optional fused ReLU):  C = [relu](A @ B)
# grid = (M/tm [parallel], K/tk [arbitrary, last]); f32 accumulator scratch.
# --------------------------------------------------------------------------
def _matmul_kernel(a_ref, b_ref, o_ref, acc_ref, *, relu):
    @pl.when(pl.program_id(1) == 0)
    def _():
        acc_ref[...] = jnp.zeros_like(acc_ref)

    acc_ref[...] += jnp.dot(a_ref[...], b_ref[...],
                            preferred_element_type=jnp.float32)

    @pl.when(pl.program_id(1) == pl.num_programs(1) - 1)
    def _():
        r = acc_ref[...]
        if relu:
            r = jnp.maximum(r, 0.0)
        o_ref[...] = r.astype(o_ref.dtype)


def _tiled_matmul(a, b, *, relu, out_dtype, tm=128, tk=128):
    M, K = a.shape
    K2, Nc = b.shape
    assert K == K2 and M % tm == 0 and K % tk == 0
    grid = (M // tm, K // tk)
    flops = 2 * M * K * Nc
    bytes_accessed = int(a.size * a.dtype.itemsize
                         + b.size * b.dtype.itemsize
                         + M * Nc * jnp.dtype(out_dtype).itemsize)
    return pl.pallas_call(
        functools.partial(_matmul_kernel, relu=relu),
        out_shape=jax.ShapeDtypeStruct((M, Nc), out_dtype),
        grid_spec=pltpu.PrefetchScalarGridSpec(
            num_scalar_prefetch=0,
            grid=grid,
            in_specs=[pl.BlockSpec((tm, tk), lambda i, k: (i, k)),
                      pl.BlockSpec((tk, Nc), lambda i, k: (k, 0))],
            out_specs=pl.BlockSpec((tm, Nc), lambda i, k: (i, 0)),
            scratch_shapes=[pltpu.VMEM((tm, Nc), jnp.float32)]),
        compiler_params=pltpu.CompilerParams(
            dimension_semantics=("parallel", "arbitrary")),
        cost_estimate=pl.CostEstimate(flops=flops, transcendentals=0,
                                      bytes_accessed=bytes_accessed),
    )(a, b)


# --------------------------------------------------------------------------
# Fusion kernel: view-1 MLP + gathered GCN layer 2 + alpha blend.
# The 2B needed rows of the propagation matrix are DMA-gathered from HBM
# (dynamic indices from SMEM) while the view-1 MLP runs.
# --------------------------------------------------------------------------
def _fusion_kernel(idx_ref, alpha_ref,
                   v_d_ref, v_p_ref, wd_ref, wp_ref, wh1_ref, wh2_ref, wo_ref,
                   h1_ref, w2_ref, prop_hbm,
                   out_ref, rows_buf, sems):
    f32 = jnp.float32
    n_rows = rows_buf.shape[0]          # 2 * B
    Bq = n_rows // 2

    # Kick off the row-gather DMAs (idx1 rows then idx2 rows).
    copies = []
    for b in range(n_rows):             # static unroll; B is small
        cp = pltpu.make_async_copy(
            prop_hbm.at[pl.ds(idx_ref[b], 1), :],
            rows_buf.at[pl.ds(b, 1), :],
            sems.at[b])
        cp.start()
        copies.append(cp)

    # ----- view 1: HDN interaction MLP (overlaps with the gather DMAs) -----
    hd = jnp.maximum(jnp.dot(v_d_ref[...], wd_ref[...],
                             preferred_element_type=f32), 0.0)
    hp = jnp.maximum(jnp.dot(v_p_ref[...], wp_ref[...],
                             preferred_element_type=f32), 0.0)
    # fused "concat([hd, hp]) @ Wh" == hd @ Wh_top + hp @ Wh_bot
    h = jnp.maximum(jnp.dot(hd, wh1_ref[...], preferred_element_type=f32)
                    + jnp.dot(hp, wh2_ref[...], preferred_element_type=f32),
                    0.0)
    # degenerate (H,1) matmul replaced by VPU mul + lane reduce
    logit1 = jnp.sum(h * wo_ref[...], axis=-1, keepdims=True)        # (B, 1)

    # ----- view 2: GCN layer 2 evaluated only on the gathered rows ----------
    for cp in copies:
        cp.wait()
    p_rows = rows_buf[...].astype(jnp.bfloat16)                      # (2B, N)
    ph1 = jnp.dot(p_rows, h1_ref[...], preferred_element_type=f32)   # (2B, H)
    e = jnp.dot(ph1.astype(jnp.bfloat16), w2_ref[...],
                preferred_element_type=f32)                          # (2B, H)
    logit2 = jnp.sum(e[:Bq] * e[Bq:], axis=-1, keepdims=True)        # (B, 1)

    # ----- MINDG fusion ------------------------------------------------------
    alpha = alpha_ref[0, 0]
    sigmoid = lambda x: 0.5 * (jnp.tanh(0.5 * x) + 1.0)  # stable, EUP tanh
    out_ref[...] = alpha * sigmoid(logit1) + (1.0 - alpha) * sigmoid(logit2)


def _fusion_call(idx, alpha, v_d, v_p, wd, wp, wh1, wh2, wo, h1, w2, prop_f32):
    B = v_d.shape[0]
    NP = prop_f32.shape[0]
    smem = pl.BlockSpec(memory_space=pltpu.MemorySpace.SMEM)
    vmem = pl.BlockSpec(memory_space=pltpu.MemorySpace.VMEM)
    hbm = pl.BlockSpec(memory_space=pl.ANY)
    return pl.pallas_call(
        _fusion_kernel,
        out_shape=jax.ShapeDtypeStruct((B, 1), jnp.float32),
        in_specs=[smem, smem] + [vmem] * 9 + [hbm],
        out_specs=vmem,
        scratch_shapes=[pltpu.VMEM((2 * B, NP), jnp.float32),
                        pltpu.SemaphoreType.DMA((2 * B,))],
    )(idx, alpha, v_d, v_p, wd, wp, wh1, wh2, wo, h1, w2, prop_f32)


# --------------------------------------------------------------------------
# Forward wrapper: lane-dense zero padding + bf16 casts + kernel calls.
# --------------------------------------------------------------------------
def mindg_forward(params, v_d, v_p, idx1, idx2, propagation_matrix, features):
    f32, bf16 = jnp.float32, jnp.bfloat16
    B, Dd = v_d.shape
    _, Dp = v_p.shape
    N, F = features.shape
    H = params["w1"].shape[1]

    NP = _round_up(N, _LANE)
    FP = _round_up(F, _LANE)
    HP = _round_up(H, _LANE)
    DdP = _round_up(Dd, _LANE)
    DpP = _round_up(Dp, _LANE)

    # zero padding is numerically inert (zero rows/cols pass through relu/dot)
    prop_f32_p = _pad2d(propagation_matrix.astype(f32), NP, NP)
    prop_bf16_p = prop_f32_p.astype(bf16)
    feat_p = _pad2d(features.astype(bf16), NP, FP)
    w1_p = _pad2d(params["w1"].astype(bf16), FP, HP)
    w2_p = _pad2d(params["w2"].astype(bf16), HP, HP)

    v_d_p = _pad2d(v_d.astype(f32), B, DdP)
    v_p_p = _pad2d(v_p.astype(f32), B, DpP)
    wd_p = _pad2d(params["wd"].astype(f32), DdP, HP)
    wp_p = _pad2d(params["wp"].astype(f32), DpP, HP)
    wh1_p = _pad2d(params["wh1"].astype(f32), HP, HP)
    wh2_p = _pad2d(params["wh2"].astype(f32), HP, HP)
    wo_row = _pad2d(params["wo"].astype(f32).reshape(1, -1), 1, HP)

    # GCN layer 1, reassociated:  h1 = relu(P @ (X @ W1))
    t = _tiled_matmul(feat_p, w1_p, relu=False, out_dtype=bf16)      # (NP, HP)
    h1 = _tiled_matmul(prop_bf16_p, t, relu=True, out_dtype=bf16)    # (NP, HP)

    idx = jnp.concatenate([jnp.asarray(idx1).reshape(-1),
                           jnp.asarray(idx2).reshape(-1)]).astype(jnp.int32)
    alpha = jnp.asarray(params["alpha"], f32).reshape(1, 1)

    return _fusion_call(idx, alpha, v_d_p, v_p_p, wd_p, wp_p, wh1_p, wh2_p,
                        wo_row, h1, w2_p, prop_f32_p)


if __name__ == "__main__":
    key = jax.random.PRNGKey(0)
    B, Dd, Dp, H, N, F = 8, 64, 64, 32, 256, 32
    ks = jax.random.split(key, 12)

    # inputs
    v_d = jax.random.normal(ks[0], (B, Dd), jnp.float32)
    v_p = jax.random.normal(ks[1], (B, Dp), jnp.float32)
    idx1 = jax.random.randint(ks[2], (B,), 0, N)
    idx2 = jax.random.randint(ks[3], (B,), 0, N)
    features = jax.random.normal(ks[4], (N, F), jnp.float32)
    adj = (jax.random.uniform(ks[5], (N, N)) < 0.05).astype(jnp.float32)
    adj = adj + adj.T + jnp.eye(N, dtype=jnp.float32)
    propagation_matrix = adj / jnp.sum(adj, axis=1, keepdims=True)

    # deterministic synthetic parameter init (no checkpoint load)
    def glorot(k, shape):
        lim = jnp.sqrt(6.0 / (shape[0] + shape[1]))
        return jax.random.uniform(k, shape, jnp.float32, -lim, lim)

    params = dict(
        wd=glorot(ks[6], (Dd, H)),
        wp=glorot(ks[7], (Dp, H)),
        wh1=glorot(ks[8], (H, H)),
        wh2=glorot(ks[9], (H, H)),
        wo=glorot(ks[10], (H, 1)),
        w1=glorot(ks[11], (F, H)),
        w2=glorot(jax.random.fold_in(key, 99), (H, H)),
        alpha=jnp.float32(0.9),   # nn.Parameter(torch.tensor(0.9))
    )

    out = mindg_forward(params, v_d, v_p, idx1, idx2,
                        propagation_matrix, features)
    jax.block_until_ready(out)
    assert out.shape == (B, 1) and out.dtype == jnp.float32
    assert bool(jnp.all(jnp.isfinite(out)))
    print("KERNEL_OK")
</pallas_src>

<mosaic_0001>
module attributes {stable_mosaic.version = 11 : i64} {
  func.func @_matmul_kernel(%arg0: i32, %arg1: i32, %arg2: memref<128x128xbf16, #tpu.memory_space<vmem>>, %arg3: memref<128x128xbf16, #tpu.memory_space<vmem>>, %arg4: memref<128x128xbf16, #tpu.memory_space<vmem>>, %arg5: memref<128x128xf32, #tpu.memory_space<vmem>>) attributes {dimension_semantics = [#tpu.dimension_semantics<parallel>, #tpu.dimension_semantics<arbitrary>], iteration_bounds = array<i64: 2, 1>, scalar_prefetch = 0 : i64, scratch_operands = 1 : i64, tpu.core_type = #tpu.core_type<tc>, window_params = [{transform_indices = @transform_0, window_bounds = array<i64: 128, 128>}, {transform_indices = @transform_1, window_bounds = array<i64: 128, 128>}, {transform_indices = @transform_2, window_bounds = array<i64: 128, 128>}]} {
    %c0_i32 = arith.constant 0 : i32
    %0 = arith.cmpi eq, %arg1, %c0_i32 : i32
    %1 = arith.extui %0 : i1 to i32
    %c0_i32_0 = arith.constant 0 : i32
    %2 = arith.cmpi ne, %1, %c0_i32_0 : i32
    scf.if %2 {
      %cst_10 = arith.constant 0.000000e+00 : f32
      %12 = vector.broadcast %cst_10 : f32 to vector<128x128xf32>
      %c0_11 = arith.constant 0 : index
      %c0_12 = arith.constant 0 : index
      %13 = vector.load %arg5[%c0_11, %c0_12] : memref<128x128xf32, #tpu.memory_space<vmem>>, vector<128x128xf32>
      tpu.vector_store %arg5[%c0_11, %c0_12], %12 {strides = array<i32>} : memref<128x128xf32, #tpu.memory_space<vmem>>, vector<128x128xf32>,
    } else {
    }
    %c0 = arith.constant 0 : index
    %c0_1 = arith.constant 0 : index
    %3 = vector.load %arg5[%c0, %c0_1] : memref<128x128xf32, #tpu.memory_space<vmem>>, vector<128x128xf32>
    %c0_2 = arith.constant 0 : index
    %c0_3 = arith.constant 0 : index
    %4 = vector.load %arg2[%c0_2, %c0_3] : memref<128x128xbf16, #tpu.memory_space<vmem>>, vector<128x128xbf16>
    %c0_4 = arith.constant 0 : index
    %c0_5 = arith.constant 0 : index
    %5 = vector.load %arg3[%c0_4, %c0_5] : memref<128x128xbf16, #tpu.memory_space<vmem>>, vector<128x128xbf16>
    %cst = arith.constant dense<0.000000e+00> : vector<128x128xf32>
    %6 = tpu.matmul %4, %5, %cst {dimension_numbers = #tpu.dot_dimension_numbers<[1], [0], [0], [1], [0, 0, 1, 1], [], []>} : vector<128x128xbf16>, vector<128x128xbf16>, vector<128x128xf32> -> vector<128x128xf32>
    %7 = arith.addf %3, %6 : vector<128x128xf32>
    %c0_6 = arith.constant 0 : index
    %c0_7 = arith.constant 0 : index
    %8 = vector.load %arg5[%c0_6, %c0_7] : memref<128x128xf32, #tpu.memory_space<vmem>>, vector<128x128xf32>
    tpu.vector_store %arg5[%c0_6, %c0_7], %7 {strides = array<i32>} : memref<128x128xf32, #tpu.memory_space<vmem>>, vector<128x128xf32>,
    %c0_i32_8 = arith.constant 0 : i32
    %9 = arith.cmpi eq, %arg1, %c0_i32_8 : i32
    %10 = arith.extui %9 : i1 to i32
    %c0_i32_9 = arith.constant 0 : i32
    %11 = arith.cmpi ne, %10, %c0_i32_9 : i32
    scf.if %11 {
      %c0_10 = arith.constant 0 : index
      %c0_11 = arith.constant 0 : index
      %12 = vector.load %arg5[%c0_10, %c0_11] : memref<128x128xf32, #tpu.memory_space<vmem>>, vector<128x128xf32>
      %13 = arith.truncf %12 : vector<128x128xf32> to vector<128x128xbf16>
      %c0_12 = arith.constant 0 : index
      %c0_13 = arith.constant 0 : index
      %14 = vector.load %arg4[%c0_12, %c0_13] : memref<128x128xbf16, #tpu.memory_space<vmem>>, vector<128x128xbf16>
      tpu.vector_store %arg4[%c0_12, %c0_13], %13 {strides = array<i32>} : memref<128x128xbf16, #tpu.memory_space<vmem>>, vector<128x128xbf16>,
    } else {
    }
    return
  }
  func.func @transform_0(%arg0: i32, %arg1: i32) -> (i32, i32) {
    %c0_i32 = arith.constant 0 : i32
    return %arg0, %arg1 : i32, i32
  }
  func.func @transform_1(%arg0: i32, %arg1: i32) -> (i32, i32) {
    %c0_i32 = arith.constant 0 : i32
    %c0_i32_0 = arith.constant 0 : i32
    return %arg1, %c0_i32 : i32, i32
  }
  func.func @transform_2(%arg0: i32, %arg1: i32) -> (i32, i32) {
    %c0_i32 = arith.constant 0 : i32
    %c0_i32_0 = arith.constant 0 : i32
    return %arg0, %c0_i32 : i32, i32
  }
}

</mosaic_0001>

<bundles_post_ra>
// kernel: tpu_custom_call.1
= control target key start
LH: loop header
LB: loop body
LE: loop exit
PB: predicated region body
PF: predicated region fallthrough
CT: control target
= control target key end

     0   :  { %7 = vsyncpa [#allocation4], 0  ;;  %s1383_s0 = inlined_call_operand.hbm [shape: bf16[256,128], index: 0, kind: input, shape index: {}]   ;;  %s1384_s1 = inlined_call_operand.hbm [shape: bf16[128,128], index: 1, kind: input, shape index: {}]   ;;  %s1385_s2 = inlined_call_operand.hbm [shape: bf16[256,128], index: 2, kind: output, shape index: {}]  }
   0x1   :  { %9 = vsyncpa [#allocation4 + $0x1], 0 }
   0x2   :  { %10 = vsyncpa [#allocation7], 0 }
   0x3   :  { %11 = vsyncpa [#allocation5], 0 }
   0x4   :  { %13 = vsyncpa [#allocation5 + $0x1], 0  ;;  %s1144_s9 = smov 0   ;;  %s1146_s10 = smov 0  }
   0x5   :  { %s1148_s11 = smov 0   ;;  %s1150_s12 = smov 0  }
   0x6   :  { %s1152_s13 = smov 0   ;;  %s1154_s14 = smov 0  }
   0x7 LB: > { %s705_s15 = sadd.s32 4294967295, %s1120_s14   ;;  %s706_s16 = sadd.s32 4294967294, %s1120_s14   ;;  %s1120_s14 = sphi %s1154_s14, %s19_s14   ;;  %s1116_s13 = sphi %s1152_s13, %s1409_s13   ;;  %s1112_s12 = sphi %s1150_s12, %s1408_s12   ;;  %s1108_s11 = sphi %s1148_s11, %s1407_s11   ;;  %s1104_s10 = sphi %s1146_s10, %s1406_s10   ;;  %s1100_s9 = sphi %s1144_s9, %s1405_s9  }
   0x8   : > { %p53_p0 = scmp.ne.s32.totalorder %s1104_s10, %s1100_s9  ;;  %p1178_p1 = scmp.eq.s32.totalorder %s705_s15, 0 }
   0x9   : > { %p1182_p2 = scmp.eq.s32.totalorder %s705_s15, 1  ;;  %p109_p3 = scmp.eq.s32.totalorder %s706_s16, 1 }
   0xa   : > { %s1390_s17 = scalar_select %p1178_p1, 1, 0 }
   0xb   : > { %s1391_s18 = scalar_select %p1182_p2, 1, 0 }
   0xc   : > { %p1188_p4 = por %p1178_p1, %p53_p0  ;;  %p707_p5 = scmp.ge.s32.totalorder %s1120_s14, 1 }
   0xd   : > { %p1193_p6 = por %p109_p3, %p53_p0  ;;  %p116_p7 = scmp.lt.s32.totalorder %s1120_s14, 3 }
   0xe   : > { %s1392_s19 = scalar_select %p1188_p4, 1, 0 }
   0xf   : > { %s1393_s20 = scalar_select %p1193_p6, 1, 0 }
  0x10   : > { %p1198_p8 = pnand %p707_p5, %p116_p7  ;;  %s1122_s22 = smov [#allocation6]  }
  0x11   : > { %s131_s23 = sshll.u32 %s1122_s22, 4  ;;  %s31_s25 = sadd.s32 1, %s1116_s13  ;;  %s132_s23 = int_to_ptr.vmem [resolvable:$true] %s131_s23 }
  0x12   : > { %s1394_s21 = scalar_select %p1198_p8, 1, 0 }
  0x13   : > { %p891_p9 = pneg %p1198_p8  ;;  %s976_s28 = scalar_lea.hbm %s1384_s1, 1024 }
  0x14   : > { %p977_p12 = scmp.ne.s32.totalorder %s1384_s1, %s976_s28  ;;  %p983_p5 = scmp.lt.u32.totalorder %s976_s28, %s1384_s1 }
  0x15   : > { %p1207_p11 = pnand %p891_p9, %p1178_p1 }
  0x17   : > { %p978_p13 = pneg %p1207_p11 }
  0x19   : > { %p979_p0 = pnand %p978_p13, %p977_p12 }
  0x1b   : > { %p980_p3 = pneg %p979_p0 }
  0x1d   : > { %p985_p7 = pnand %p983_p5, %p980_p3 }
  0x1f   : > { %988 = shalt.err (!%p985_p7)
}
  0x20   : > { %s989_s5 = scalar_lea.vmem %s132_s23, 1024  ;;  %p997_p1 = scmp.lt.s32.totalorder %s132_s23, %s132_s23 }
  0x21   : > { %p990_p9 = scmp.ne.s32.totalorder %s132_s23, %s989_s5  ;;  %p998_p4 = scmp.lt.s32.totalorder %s989_s5, %s989_s5 }
  0x23   : > { %p992_p10 = pnand %p990_p9, %p978_p13  ;;  %p999_p8 = por %p998_p4, %p997_p1 }
  0x25   : > { %p993_p6 = pneg %p992_p10 }
  0x27   : > { %p1000_p2 = pnand %p999_p8, %p993_p6 }
  0x29   : > { %1003 = shalt.err (!%p1000_p2)
}
  0x2a   : > { %s1123_s6 = smov 64   ;;  %s1124_s7 = smov 4  }
  0x2b   : > { %894 = dma.hbm_to_vmem [thread:$0]  (!%p1207_p11), %s1384_s1, 1024, %s132_s23, [#allocation7], %s1123_s6, %s1123_s6, %s1124_s7  }
  0x2c   : > { %p33_p1 = scmp.ge.s32.totalorder %s31_s25, 2  ;;  %s40_s16 = sadd.s32 1, %s1108_s11 }
  0x2d   : > { %p47_p2 = scmp.ne.s32.totalorder %s1108_s11, %s1104_s10  ;;  %p48_p4 = scmp.eq.s32.totalorder %s1120_s14, 0 }
  0x2e   : > { %s1411_s25 = smov (%p33_p1, %s31_s25), 0  ;;  %p1397_p8 = scmp.ne.s32.totalorder %s1391_s18, 0 }
  0x2f   : > { %p1237_p6 = por %p48_p4, %p47_p2  ;;  %s35_s26 = ssub.s32 %s1116_s13, %s1411_s25 }
  0x30   : > { %p1243_p10 = por %p1397_p8, %p47_p2  ;;  %p904_p12 = scmp.lt.s32.totalorder %s1120_s14, 2 }
  0x31   : > { %p38_p11 = scmp.eq.s32.totalorder %s35_s26, 0  ;;  %s145_s23 = sand.u32 1, %s1108_s11  }
  0x32   : > { %s710_s27 = sshll.u32 %s145_s23, 6  ;;  %s754_s29 = sshll.u32 %s1116_s13, 10 }
  0x33   : > { %s1252_s28 = scalar_select %p38_p11, %s1108_s11, %s40_s16  }
  0x34   : > { %s1258_s4 = scalar_lea.hbm %s1383_s0, %s754_s29  ;;  %s149_s18 = scalar_lea.vmem [#allocation3], %s710_s27 }
  0x35   : > { %s157_s5 = sshll.u32 %s149_s18, 4  ;;  %p1264_p13 = pnand %p904_p12, %p1237_p6  ;;  %s1260_s5 = int_to_ptr.vmem [resolvable:$true] %s157_s5 }
  0x36   : > { %s1268_s15 = scalar_lea.sflag [#allocation4], %s145_s23  ;;  %s1004_s16 = scalar_lea.hbm %s1258_s4, 1024 }
  0x37   : > { %p1005_p0 = scmp.ne.s32.totalorder %s1258_s4, %s1004_s16  ;;  %p1006_p3 = pneg %p1264_p13 }
  0x38   : > { %s1009_s22 = scalar_lea.hbm %s1383_s0, 2048  ;;  %p1010_p9 = scmp.lt.u32.totalorder %s1258_s4, %s1383_s0 }
  0x39   : > { %p1007_p5 = pnand %p1006_p3, %p1005_p0  ;;  %p1011_p1 = scmp.lt.u32.totalorder %s1009_s22, %s1004_s16 }
  0x3a   : > { %p1013_p4 = scmp.lt.u32.totalorder %s1004_s16, %s1258_s4 }
  0x3b   : > { %p1008_p7 = pneg %p1007_p5  ;;  %p1012_p2 = por %p1011_p1, %p1010_p9 }
  0x3d   : > { %p1014_p6 = por %p1013_p4, %p1012_p2 }
  0x3f   : > { %p1015_p8 = pnand %p1014_p6, %p1008_p7 }
  0x41   : > { %1018 = shalt.err (!%p1015_p8)
}
  0x42   : > { %s1019_s23 = scalar_lea.vmem %s1260_s5, 1024  ;;  %s1125_s3 = smov [#allocation3]  }
  0x43   : > { %p1020_p12 = scmp.ne.s32.totalorder %s1260_s5, %s1019_s23  ;;  %s1024_s18 = sshll.u32 %s1125_s3, 4  ;;  %s1025_s18 = int_to_ptr.vmem [resolvable:$false] %s1024_s18 }
  0x44   : > { %s1026_s26 = scalar_lea.vmem %s1025_s18, 2048  ;;  %p1027_p5 = scmp.lt.s32.totalorder %s1260_s5, %s1025_s18 }
  0x45   : > { %p1022_p11 = pnand %p1020_p12, %p1006_p3  ;;  %p1028_p9 = scmp.lt.s32.totalorder %s1026_s26, %s1019_s23 }
  0x47   : > { %p1023_p0 = pneg %p1022_p11  ;;  %p1029_p1 = por %p1028_p9, %p1027_p5 }
  0x49   : > { %p1030_p2 = pnand %p1029_p1, %p1023_p0 }
  0x4b   : > { %1033 = shalt.err (!%p1030_p2)
}
  0x4c   : > { %898 = dma.hbm_to_vmem [thread:$0]  (!%p1264_p13), %s1258_s4, 1024, %s1260_s5, %s1268_s15, %s1123_s6, %s1123_s6, %s1124_s7  }
  0x4d   : > { %p1400_p3 = scmp.ne.s32.totalorder %s1394_s21, 0 }
  0x4e   : > { %s1302_s16 = sand.u32 (!%p1400_p3), 1, %s1104_s10   ;;  %p1401_p7 = scmp.ne.s32.totalorder (!%p1400_p3), %s1392_s19, 0 }
  0x4f   : > { %169 = sbr.rel (%p1400_p3) target bundleno = 363 (0x16b), region = 28  ;;  %s714_s27 = sshll.u32 (!%p1400_p3), %s1302_s16, 6 }
  0x50   : > { %s172_s22 = scalar_lea.sflag (!%p1400_p3), [#allocation4], %s1302_s16  ;;  %s1308_s8 = scalar_lea.vmem (!%p1400_p3), [#allocation3], %s714_s27 }
  0x56   : > { %1087 = dma.done.wait (%p1401_p7), %s172_s22, 1024  }
  0x57   : > { %1089 = vsyncadd (%p1401_p7), %s172_s22, 4294966272  ;;  %p1402_p13 = scmp.ne.s32.totalorder %s1390_s17, 0 }
  0x59   : > { %1091 = dma.done.wait (%p1402_p13), [#allocation7], 1024  }
  0x5a   : > { %1093 = vsyncadd (%p1402_p13), [#allocation7], 4294966272  ;;  %v960_v0 = vld [vmem:[#allocation6] sm:$0xff]   ;;  %v961_v1 = vld [vmem:[#allocation6 + $0x8] sm:$0xff]   ;;  %s199_s17 = scalar_lea.vmem [#allocation8], %s714_s27  ;;  %s771_s21 = sshll.u32 %s1112_s12, 10 }
  0x5b   : > { %835 = vmatprep.subr.bf16.mxu0 %v960_v0  ;;  %867 = vmatprep.subr.bf16.mxu1 %v960_v0  ;;  %v962_v2 = vld [vmem:[#allocation6 + $0x10] sm:$0xff]   ;;  %v963_v3 = vld [vmem:[#allocation6 + $0x18] sm:$0xff]   ;;  %v968_v4 = vld [vmem:[%s1308_s8] sm:$0xff]   ;;  %s610_s19 = sshll.u32 %s199_s17, 4  ;;  %s1334_s4 = scalar_lea.hbm %s1385_s2, %s771_s21  ;;  %s1329_s19 = int_to_ptr.vmem [resolvable:$true] %s610_s19 }
  0x5c   : > { %836 = vmatpush3.bf16.msra.mxu0 %v960_v0  ;;  %875 = vmatpush3.bf16.msra.mxu1 %v960_v0  ;;  %v969_v5 = vld [vmem:[%s1308_s8 + $0x20] sm:$0xff]   ;;  %v965_v7 = vld [vmem:[#allocation6 + $0x28] sm:$0xff]   ;;  %v966_v8 = vld [vmem:[#allocation6 + $0x30] sm:$0xff]   ;;  %s597_s12 = scalar_lea.sflag [#allocation5], %s1302_s16  ;;  %s1034_s5 = scalar_lea.vmem %s1329_s19, 1024 }
  0x5d   : > { %837 = vmatprep.subr.bf16.mxu0 %v961_v1  ;;  %868 = vmatprep.subr.bf16.mxu1 %v961_v1  ;;  %v964_v6 = vld [vmem:[#allocation6 + $0x20] sm:$0xff]   ;;  %v967_v9 = vld [vmem:[#allocation6 + $0x38] sm:$0xff]   ;;  %v970_v10 = vld [vmem:[%s1308_s8 + $0x8] sm:$0xff]   ;;  %p1035_p4 = scmp.ne.s32.totalorder %s1329_s19, %s1034_s5  ;;  %s1126_s15 = smov [#allocation8]  }
  0x5e   : > { %851 = vmatprep.mubr.bf16.mxu0 %v968_v4  ;;  %859 = vmatprep.mubr.bf16.mxu1 %v969_v5  ;;  %v971_v11 = vld [vmem:[%s1308_s8 + $0x28] sm:$0xff]   ;;  %v972_v12 = vld [vmem:[%s1308_s8 + $0x10] sm:$0xff]   ;;  %v974_v14 = vld [vmem:[%s1308_s8 + $0x18] sm:$0xff]   ;;  %s1038_s29 = sshll.u32 %s1126_s15, 4  ;;  %s1039_s29 = int_to_ptr.vmem [resolvable:$false] %s1038_s29 }
  0x5f   : > { %v973_v13 = vld [vmem:[%s1308_s8 + $0x30] sm:$0xff]   ;;  %v975_v15 = vld [vmem:[%s1308_s8 + $0x38] sm:$0xff]   ;;  %p1036_p6 = pnand %p1035_p4, %p1243_p10  ;;  %s1040_s30 = scalar_lea.vmem %s1039_s29, 2048 }
  0x60   : > { %838 = vmatpush3.bf16.msra.mxu0 %v961_v1  ;;  %876 = vmatpush3.bf16.msra.mxu1 %v961_v1  ;;  %p1041_p12 = scmp.lt.s32.totalorder %s1329_s19, %s1039_s29  ;;  %p1042_p11 = scmp.lt.s32.totalorder %s1040_s30, %s1034_s5 }
  0x61   : > { %839 = vmatprep.subr.bf16.mxu0 %v962_v2  ;;  %869 = vmatprep.subr.bf16.mxu1 %v962_v2  ;;  %p1037_p8 = pneg %p1036_p6 }
  0x62   : > { %p1043_p0 = por %p1042_p11, %p1041_p12 }
  0x64   : > { %840 = vmatpush3.bf16.msra.mxu0 %v962_v2  ;;  %877 = vmatpush3.bf16.msra.mxu1 %v962_v2  ;;  %p1044_p5 = pnand %p1043_p0, %p1037_p8 }
  0x65   : > { %841 = vmatprep.subr.bf16.mxu0 %v963_v3  ;;  %870 = vmatprep.subr.bf16.mxu1 %v963_v3 }
  0x68   : > { %842 = vmatpush3.bf16.msra.mxu0 %v963_v3  ;;  %878 = vmatpush3.bf16.msra.mxu1 %v963_v3 }
  0x69   : > { %843 = vmatprep.subr.bf16.mxu0 %v964_v6  ;;  %871 = vmatprep.subr.bf16.mxu1 %v964_v6 }
  0x6c   : > { %844 = vmatpush3.bf16.msra.mxu0 %v964_v6  ;;  %879 = vmatpush3.bf16.msra.mxu1 %v964_v6 }
  0x6d   : > { %845 = vmatprep.subr.bf16.mxu0 %v965_v7  ;;  %872 = vmatprep.subr.bf16.mxu1 %v965_v7 }
  0x70   : > { %846 = vmatpush3.bf16.msra.mxu0 %v965_v7  ;;  %880 = vmatpush3.bf16.msra.mxu1 %v965_v7 }
  0x71   : > { %847 = vmatprep.subr.bf16.mxu0 %v966_v8  ;;  %873 = vmatprep.subr.bf16.mxu1 %v966_v8 }
  0x74   : > { %848 = vmatpush3.bf16.msra.mxu0 %v966_v8  ;;  %881 = vmatpush3.bf16.msra.mxu1 %v966_v8 }
  0x75   : > { %849 = vmatprep.subr.bf16.mxu0 %v967_v9  ;;  %874 = vmatprep.subr.bf16.mxu1 %v967_v9 }
  0x78   : > { %850 = vmatpush3.bf16.msra.mxu0 %v967_v9  ;;  %882 = vmatpush3.bf16.msra.mxu1 %v967_v9 }
  0x7b   : > { %852 = vmatmul.mubr.bf16.vlgmr.msra.gmra.mrb[0].mxu0 %v970_v10  ;;  %860 = vmatmul.mubr.bf16.vlgmr.msra.gmra.mrb[0].mxu1 %v971_v11 }
  0x7c   : > { %855 = vmatprep.mubr.bf16.mxu0 %v972_v12  ;;  %863 = vmatprep.mubr.bf16.mxu1 %v973_v13 }
  0x83   : > { %856 = vmatmul.mubr.bf16.gmra.mrb[4].mxu0 %v974_v14  ;;  %864 = vmatmul.mubr.bf16.gmra.mrb[4].mxu1 %v975_v15 }
 0x14e   : > { %v853_v16 = vpop.f32.mrb[0].mxu0  ;;  %v861_v17 = vpop.f32.mrb[0].mxu1 }
 0x14f   : > { %v402_v18 = vpop.f32.mrb[1].mxu0  ;;  %v434_v19 = vpop.f32.mrb[1].mxu1 }
 0x150   : > { %v854_v20 = vpop.f32.mrb[2].mxu0  ;;  %v862_v21 = vpop.f32.mrb[2].mxu1 }
 0x151   : > { %v780_v22 = vpack.c.bf16 %v854_v20, %v853_v16  ;;  %v800_v23 = vpack.c.bf16 %v862_v21, %v861_v17  ;;  %v405_v24 = vpop.f32.mrb[3].mxu0  ;;  %v437_v25 = vpop.f32.mrb[3].mxu1 }
 0x152   : > { %v775_v26 = vpack.c.bf16 %v405_v24, %v402_v18  ;;  %v795_v27 = vpack.c.bf16 %v437_v25, %v434_v19 }
 0x153   : > { %812 = vst [vmem:[%s199_s17 + $0x8] sm:$0xff] %v780_v22   ;;  %816 = vst [vmem:[%s199_s17 + $0x28] sm:$0xff] %v800_v23  }
 0x154   : > { %776 = vst [vmem:[%s199_s17] sm:$0xff] %v775_v26   ;;  %815 = vst [vmem:[%s199_s17 + $0x20] sm:$0xff] %v795_v27  }
 0x156   : > { %v857_v28 = vpop.f32.mrb[4].mxu0  ;;  %v865_v29 = vpop.f32.mrb[4].mxu1 }
 0x157   : > { %v418_v30 = vpop.f32.mrb[5].mxu0  ;;  %v450_v31 = vpop.f32.mrb[5].mxu1 }
 0x158   : > { %v858_v32 = vpop.f32.mrb[6].mxu0  ;;  %v866_v33 = vpop.f32.mrb[6].mxu1 }
 0x159   : > { %v790_v34 = vpack.c.bf16 %v858_v32, %v857_v28  ;;  %v810_v35 = vpack.c.bf16 %v866_v33, %v865_v29  ;;  %v421_v36 = vpop.f32.mrb[7].mxu0  ;;  %v453_v37 = vpop.f32.mrb[7].mxu1 }
 0x15a   : > { %v785_v38 = vpack.c.bf16 %v421_v36, %v418_v30  ;;  %v805_v39 = vpack.c.bf16 %v453_v37, %v450_v31 }
 0x15b   : > { %814 = vst [vmem:[%s199_s17 + $0x18] sm:$0xff] %v790_v34   ;;  %818 = vst [vmem:[%s199_s17 + $0x38] sm:$0xff] %v810_v35  }
 0x15c   : > { %813 = vst [vmem:[%s199_s17 + $0x10] sm:$0xff] %v785_v38   ;;  %817 = vst [vmem:[%s199_s17 + $0x30] sm:$0xff] %v805_v39  }
 0x15d   : > { %1047 = shalt.err (!%p1044_p5)
}
 0x15e   : > { %s1048_s23 = scalar_lea.hbm %s1334_s4, 1024  ;;  %s1052_s26 = scalar_lea.hbm %s1385_s2, 2048 }
 0x15f   : > { %p1049_p9 = scmp.ne.s32.totalorder %s1334_s4, %s1048_s23  ;;  %p1053_p3 = scmp.lt.u32.totalorder %s1334_s4, %s1385_s2 }
 0x160   : > { %p1054_p7 = scmp.lt.u32.totalorder %s1052_s26, %s1048_s23  ;;  %p1056_p4 = scmp.lt.u32.totalorder %s1048_s23, %s1334_s4 }
 0x161   : > { %p1050_p1 = pnand %p1049_p9, %p1243_p10 }
 0x162   : > { %p1055_p13 = por %p1054_p7, %p1053_p3 }
 0x163   : > { %p1051_p2 = pneg %p1050_p1 }
 0x164   : > { %p1057_p6 = por %p1056_p4, %p1055_p13 }
 0x166   : > { %p1058_p8 = pnand %p1057_p6, %p1051_p2 }
 0x168   : > { %1061 = shalt.err (!%p1058_p8)
}
 0x169   : > { %s1127_s8 = smov 64   ;;  %s1128_s17 = smov 4  }
 0x16a   : > { %889 = dma.vmem_to_hbm [thread:$0]  (%p1243_p10), %s1329_s19, 1024, %s1334_s4, %s597_s12, %s1127_s8, %s1127_s8, %s1128_s17  }
 0x16b PF: > { %s625_s21 = sand.u32 1, %s1100_s9   ;;  %p1403_p12 = scmp.ne.s32.totalorder %s1393_s20, 0 }
 0x16c   : > { %p1404_p11 = scmp.ge.s32.totalorder %s1120_s14, 2  ;;  %s626_s6 = scalar_lea.sflag [#allocation5], %s625_s21 }
 0x16e   : > { %p900_p0 = pnand %p1404_p11, %p1403_p12 }
 0x170   : > { %1095 = dma.done.wait (!%p900_p0), %s626_s6, 1024  }
 0x171   : > { %1097 = vsyncadd (!%p900_p0), %s626_s6, 4294966272  ;;  %s19_s14 = sadd.s32 1, %s1120_s14   ;;  %s1405_s9 = smov %s1104_s10 }
 0x172   : > { %p16_p5 = scmp.ge.s32.totalorder %s19_s14, 4   ;;  %s1406_s10 = smov %s1108_s11 }
 0x173   : > { %s1407_s11 = smov %s1252_s28  ;;  %s1408_s12 = smov %s1116_s13 }
 0x174   : > { %s1409_s13 = smov %s1411_s25  ;;  %18 = sbr.rel (!%p16_p5) target bundleno = 7 (0x7), region = 86 }
 0x17b   :  { %631 = vsyncpa [#allocation4], 1 }
 0x17c   :  { %633 = vsyncpa [#allocation4 + $0x1], 1 }
 0x17d   :  { %634 = vsyncpa [#allocation7], 1 }
 0x17e   :  { %635 = vsyncpa [#allocation5], 1 }
 0x17f   :  { %637 = vsyncpa [#allocation5 + $0x1], 1 }

</bundles_post_ra>
